<compile_context>
chip_gen: v7x
topology: tpu7x:2x2x1
jax: 0.10.0
libtpu: 0.0.40
codegen_flags: <defaults>
</compile_context>

<pallas_src>
import functools

import jax
import jax.numpy as jnp
from jax.experimental import pallas as pl
from jax.experimental.pallas import tpu as pltpu  # noqa: F401  (imported for TPU backend parity)


# ----------------------------- Pallas kernel ------------------------------ #
def _criterion_kernel(logits_ref, sbox_ref, tbox_ref, qm_ref, lm_ref,
                      bce_ref, l1_ref, giou_ref, cnt_ref):
    """Fused DETR criterion, single grid step.

    logits_ref : (H, N)     objectness probs, heads on the sublane axis
    sbox_ref   : (4, H, N)  predicted boxes, coordinate-major (cx, cy, w, h)
    tbox_ref   : (4, 1, N)  target boxes, shared across heads
    qm_ref     : (1, N)     queries mask (float 0/1)
    lm_ref     : (1, N)     labels mask  (float 0/1) == BCE target
    bce_ref    : (H, 1)     sum of masked BCE per head
    l1_ref     : (H, 1)     sum of masked L1 per head
    giou_ref   : (H, 1)     sum of masked (1 - GIoU) per head
    cnt_ref    : (2, 1)     [sum(queries_mask); sum(labels_mask)]
    """
    qm = qm_ref[...]                                    # (1, N)
    lm = lm_ref[...]                                    # (1, N)

    # ---- loss_labels: BCE(pred, labels_mask); torch BCELoss clamps log at -100.
    p = logits_ref[...]                                 # (H, N)
    log_p = jnp.maximum(jnp.log(p), -100.0)
    log_1mp = jnp.maximum(jnp.log(1.0 - p), -100.0)
    bce = -(lm * log_p + (1.0 - lm) * log_1mp)          # finite everywhere
    bce_ref[...] = jnp.sum(bce * qm, axis=1, keepdims=True)

    # ---- coordinates (coordinate-major layout -> plain major-dim slices).
    sb = sbox_ref[...]                                  # (4, H, N)
    tb = tbox_ref[...]                                  # (4, 1, N)
    scx, scy, sw, sh = sb[0], sb[1], sb[2], sb[3]       # (H, N) each
    tcx, tcy, tw, th = tb[0], tb[1], tb[2], tb[3]       # (1, N) each

    # ---- loss_boxes: L1 (multiply-mask; values are finite).
    l1 = (jnp.abs(scx - tcx) + jnp.abs(scy - tcy)
          + jnp.abs(sw - tw) + jnp.abs(sh - th))        # (H, N)
    l1_ref[...] = jnp.sum(l1 * lm, axis=1, keepdims=True)

    # ---- loss_boxes: GIoU (diagonal of generalized_box_iou).
    sx1, sy1 = scx - 0.5 * sw, scy - 0.5 * sh
    sx2, sy2 = scx + 0.5 * sw, scy + 0.5 * sh
    tx1, ty1 = tcx - 0.5 * tw, tcy - 0.5 * th
    tx2, ty2 = tcx + 0.5 * tw, tcy + 0.5 * th

    area_s = (sx2 - sx1) * (sy2 - sy1)
    area_t = (tx2 - tx1) * (ty2 - ty1)
    iw = jnp.maximum(jnp.minimum(sx2, tx2) - jnp.maximum(sx1, tx1), 0.0)
    ih = jnp.maximum(jnp.minimum(sy2, ty2) - jnp.maximum(sy1, ty1), 0.0)
    inter = iw * ih
    union = area_s + area_t - inter
    ew = jnp.maximum(sx2, tx2) - jnp.minimum(sx1, tx1)
    eh = jnp.maximum(sy2, ty2) - jnp.minimum(sy1, ty1)
    earea = ew * eh

    # EUP approx reciprocal + two Newton-Raphson steps (replaces the exact VPU
    # divide sequence; NR brings the error to ~1 ulp regardless of seed quality).
    inv_union = pl.reciprocal(union, approx=True)
    inv_union = inv_union * (2.0 - union * inv_union)
    inv_union = inv_union * (2.0 - union * inv_union)
    inv_earea = pl.reciprocal(earea, approx=True)
    inv_earea = inv_earea * (2.0 - earea * inv_earea)
    inv_earea = inv_earea * (2.0 - earea * inv_earea)

    giou = inter * inv_union - (earea - union) * inv_earea      # (H, N)
    # Padded / degenerate entries have union == earea == 0 -> NaN; keep the
    # select (NOT a multiply-mask) so NaN never reaches the lane reduction.
    giou_ref[...] = jnp.sum(jnp.where(lm > 0.5, 1.0 - giou, 0.0),
                            axis=1, keepdims=True)

    # ---- normalizers folded into the same kernel (no standalone XLA sums).
    cnt_ref[0:1, :] = jnp.sum(qm, axis=1, keepdims=True)
    cnt_ref[1:2, :] = jnp.sum(lm, axis=1, keepdims=True)


# --------------------------- jitted forward path --------------------------- #
@functools.partial(jax.jit, static_argnames=("loss_names",))
def _criterion_forward(head_logits, head_boxes, labels, queries_mask,
                       labels_mask, *, loss_names):
    """head_logits: tuple of (B, Q); head_boxes: tuple of (B, Q, 4)."""
    H = len(head_logits)
    B, Q = head_logits[0].shape
    N = B * Q
    Npad = ((N + 127) // 128) * 128          # lane-dense padding
    pad = Npad - N

    # Math stays f32 in-kernel; cast fuses with the stack/transpose/pad under jit.
    logits = jnp.stack(head_logits).astype(jnp.float32).reshape(H, N)       # (H, N)
    boxes = jnp.stack(head_boxes).astype(jnp.float32).reshape(H, N, 4)
    boxes = jnp.transpose(boxes, (2, 0, 1))                                  # (4, H, N)
    tbox = labels[..., 1:].astype(jnp.float32).reshape(N, 4).T.reshape(4, 1, N)
    qm = queries_mask.astype(jnp.float32).reshape(1, N)
    lm = labels_mask.astype(jnp.float32).reshape(1, N)

    if pad:
        logits = jnp.pad(logits, ((0, 0), (0, pad)))
        boxes = jnp.pad(boxes, ((0, 0), (0, 0), (0, pad)))
        tbox = jnp.pad(tbox, ((0, 0), (0, 0), (0, pad)))
        qm = jnp.pad(qm, ((0, 0), (0, pad)))
        lm = jnp.pad(lm, ((0, 0), (0, pad)))

    # Single gridless pallas_call: whole arrays as single VMEM blocks.
    bce_s, l1_s, giou_s, cnt = pl.pallas_call(
        _criterion_kernel,
        out_shape=(
            jax.ShapeDtypeStruct((H, 1), jnp.float32),
            jax.ShapeDtypeStruct((H, 1), jnp.float32),
            jax.ShapeDtypeStruct((H, 1), jnp.float32),
            jax.ShapeDtypeStruct((2, 1), jnp.float32),
        ),
    )(logits, boxes, tbox, qm, lm)

    # TODO(synk): torch.distributed all_reduce / world_size not modeled
    # (single device: num = clamp(sum, min=1)).
    num_q = jnp.maximum(cnt[0, 0], 1.0)
    num_l = jnp.maximum(cnt[1, 0], 1.0)

    losses = {}
    for hi in range(H):
        sfx = '' if hi == 0 else f'_{hi - 1}'
        if 'labels' in loss_names:
            losses['loss_bce' + sfx] = bce_s[hi, 0] / num_q
        if 'boxes' in loss_names:
            losses['loss_bbox' + sfx] = l1_s[hi, 0] / num_l
            losses['loss_giou' + sfx] = giou_s[hi, 0] / num_l
    return losses


# ------------------------------ Module port -------------------------------- #
class SetCriterion:
    """JAX/Pallas port of the DETR SetCriterion forward pass."""

    def __init__(self, weight_dict, losses):
        self.weight_dict = weight_dict   # stored but (as in torch forward) not applied here
        self.losses = tuple(losses)

    def __call__(self, outputs, labels, queries_mask, labels_mask):
        head_logits = [outputs['pred_logits']]
        head_boxes = [outputs['pred_boxes']]
        for aux in outputs.get('aux_outputs', []):
            head_logits.append(aux['pred_logits'])
            head_boxes.append(aux['pred_boxes'])
        return _criterion_forward(tuple(head_logits), tuple(head_boxes),
                                  labels, queries_mask, labels_mask,
                                  loss_names=self.losses)


# ----------------------------- pure-JAX reference -------------------------- #
def _reference(outputs, labels, queries_mask, labels_mask, loss_names):
    num_l = jnp.maximum(labels_mask.sum().astype(jnp.float32), 1.0)
    num_q = jnp.maximum(queries_mask.sum().astype(jnp.float32), 1.0)
    target_boxes = labels[..., 1:]

    def to_xyxy(b):
        cx, cy, w, h = b[..., 0], b[..., 1], b[..., 2], b[..., 3]
        return cx - 0.5 * w, cy - 0.5 * h, cx + 0.5 * w, cy + 0.5 * h

    def head(out_dict):
        res = {}
        if 'labels' in loss_names:
            p = out_dict['pred_logits'].astype(jnp.float32)
            t = labels_mask.astype(jnp.float32)
            bce = -(t * jnp.maximum(jnp.log(p), -100.0)
                    + (1.0 - t) * jnp.maximum(jnp.log(1.0 - p), -100.0))
            res['loss_bce'] = jnp.where(queries_mask, bce, 0.0).sum() / num_q
        if 'boxes' in loss_names:
            sb = out_dict['pred_boxes'].astype(jnp.float32)
            tb = target_boxes.astype(jnp.float32)
            l1 = jnp.abs(sb - tb)
            res['loss_bbox'] = jnp.where(labels_mask[..., None], l1, 0.0).sum() / num_l
            sx1, sy1, sx2, sy2 = to_xyxy(sb)
            tx1, ty1, tx2, ty2 = to_xyxy(tb)
            area_s = (sx2 - sx1) * (sy2 - sy1)
            area_t = (tx2 - tx1) * (ty2 - ty1)
            iw = jnp.maximum(jnp.minimum(sx2, tx2) - jnp.maximum(sx1, tx1), 0.0)
            ih = jnp.maximum(jnp.minimum(sy2, ty2) - jnp.maximum(sy1, ty1), 0.0)
            inter = iw * ih
            union = area_s + area_t - inter
            iou = inter / union
            ew = jnp.maximum(jnp.maximum(sx2, tx2) - jnp.minimum(sx1, tx1), 0.0)
            eh = jnp.maximum(jnp.maximum(sy2, ty2) - jnp.minimum(sy1, ty1), 0.0)
            earea = ew * eh
            giou = iou - (earea - union) / earea
            res['loss_giou'] = jnp.where(labels_mask, 1.0 - giou, 0.0).sum() / num_l
        return res

    losses = dict(head({k: v for k, v in outputs.items() if k != 'aux_outputs'}))
    if 'aux_outputs' in outputs:
        for i, aux in enumerate(outputs['aux_outputs']):
            losses.update({k + f'_{i}': v for k, v in head(aux).items()})
    return losses


# --------------------------------- main ------------------------------------ #
if __name__ == "__main__":
    B, Q = 2, 64   # batch, num queries (== max seq len of labels)
    key = jax.random.PRNGKey(0)
    k1, k2, k3, k4, k5, k6 = jax.random.split(key, 6)

    pred_logits = jax.nn.sigmoid(jax.random.normal(k1, (B, Q), jnp.float32))
    pred_boxes = jax.nn.sigmoid(jax.random.normal(k2, (B, Q, 4), jnp.float32))
    aux_outputs = [{
        'pred_logits': jax.nn.sigmoid(jax.random.normal(k3, (B, Q), jnp.float32)),
        'pred_boxes': jax.nn.sigmoid(jax.random.normal(k4, (B, Q, 4), jnp.float32)),
    }]
    outputs = {'pred_logits': pred_logits, 'pred_boxes': pred_boxes,
               'aux_outputs': aux_outputs}

    # labels: (B, Q, 5) = [class_id, cx, cy, w, h]
    cls = jax.random.randint(k5, (B, Q, 1), 0, 10).astype(jnp.float32)
    gt_boxes = jax.nn.sigmoid(jax.random.normal(k6, (B, Q, 4), jnp.float32))
    labels = jnp.concatenate([cls, gt_boxes], axis=-1)

    idx = jnp.arange(Q)[None, :]
    queries_mask = idx < jnp.array([40, 25])[:, None]   # (B, Q) bool
    labels_mask = idx < jnp.array([7, 13])[:, None]     # (B, Q) bool

    criterion = SetCriterion(
        weight_dict={'loss_bce': 1.0, 'loss_bbox': 5.0, 'loss_giou': 2.0},
        losses=['labels', 'boxes'])

    losses = criterion(outputs, labels, queries_mask, labels_mask)
    losses = jax.block_until_ready(losses)

    ref = _reference(outputs, labels, queries_mask, labels_mask, criterion.losses)
    for k in ref:
        assert jnp.allclose(losses[k], ref[k], rtol=1e-5, atol=1e-5), \
            (k, float(losses[k]), float(ref[k]))

    print("KERNEL_OK")
</pallas_src>

<mosaic_0001>
module attributes {stable_mosaic.version = 11 : i64} {
  func.func @_criterion_kernel(%arg0: memref<2x128xf32, #tpu.memory_space<vmem>>, %arg1: memref<4x2x128xf32, #tpu.memory_space<vmem>>, %arg2: memref<4x1x128xf32, #tpu.memory_space<vmem>>, %arg3: memref<1x128xf32, #tpu.memory_space<vmem>>, %arg4: memref<1x128xf32, #tpu.memory_space<vmem>>, %arg5: memref<2x1xf32, #tpu.memory_space<vmem>>, %arg6: memref<2x1xf32, #tpu.memory_space<vmem>>, %arg7: memref<2x1xf32, #tpu.memory_space<vmem>>, %arg8: memref<2x1xf32, #tpu.memory_space<vmem>>) attributes {dimension_semantics = [], scalar_prefetch = 0 : i64, scratch_operands = 0 : i64, tpu.core_type = #tpu.core_type<tc>} {
    %c0 = arith.constant 0 : index
    %c0_0 = arith.constant 0 : index
    %0 = vector.load %arg3[%c0, %c0_0] : memref<1x128xf32, #tpu.memory_space<vmem>>, vector<1x128xf32>
    %c0_1 = arith.constant 0 : index
    %c0_2 = arith.constant 0 : index
    %1 = vector.load %arg4[%c0_1, %c0_2] : memref<1x128xf32, #tpu.memory_space<vmem>>, vector<1x128xf32>
    %c0_3 = arith.constant 0 : index
    %c0_4 = arith.constant 0 : index
    %2 = vector.load %arg0[%c0_3, %c0_4] : memref<2x128xf32, #tpu.memory_space<vmem>>, vector<2x128xf32>
    %3 = math.log %2 : vector<2x128xf32>
    %cst = arith.constant -1.000000e+02 : f32
    %4 = vector.broadcast %cst : f32 to vector<2x128xf32>
    %5 = arith.maximumf %3, %4 : vector<2x128xf32>
    %cst_5 = arith.constant 1.000000e+00 : f32
    %6 = vector.broadcast %cst_5 : f32 to vector<2x128xf32>
    %7 = arith.subf %6, %2 : vector<2x128xf32>
    %8 = math.log %7 : vector<2x128xf32>
    %cst_6 = arith.constant -1.000000e+02 : f32
    %9 = vector.broadcast %cst_6 : f32 to vector<2x128xf32>
    %10 = arith.maximumf %8, %9 : vector<2x128xf32>
    %11 = vector.broadcast %1 : vector<1x128xf32> to vector<2x128xf32>
    %12 = arith.mulf %11, %5 : vector<2x128xf32>
    %cst_7 = arith.constant 1.000000e+00 : f32
    %13 = vector.broadcast %cst_7 : f32 to vector<1x128xf32>
    %14 = arith.subf %13, %1 : vector<1x128xf32>
    %15 = vector.broadcast %14 : vector<1x128xf32> to vector<2x128xf32>
    %16 = arith.mulf %15, %10 : vector<2x128xf32>
    %17 = arith.addf %12, %16 : vector<2x128xf32>
    %cst_8 = arith.constant 0.000000e+00 : f32
    %18 = vector.broadcast %cst_8 : f32 to vector<2x128xf32>
    %19 = arith.subf %18, %17 : vector<2x128xf32>
    %20 = vector.broadcast %0 : vector<1x128xf32> to vector<2x128xf32>
    %21 = arith.mulf %19, %20 : vector<2x128xf32>
    %cst_9 = arith.constant dense<0.000000e+00> : vector<2xf32>
    %22 = vector.multi_reduction <add>, %21, %cst_9 [1] : vector<2x128xf32> to vector<2xf32>
    %23 = vector.shape_cast %22 : vector<2xf32> to vector<2x1xf32>
    %c0_10 = arith.constant 0 : index
    %c0_11 = arith.constant 0 : index
    %24 = vector.load %arg5[%c0_10, %c0_11] : memref<2x1xf32, #tpu.memory_space<vmem>>, vector<2x1xf32>
    tpu.vector_store %arg5[%c0_10, %c0_11], %23 {strides = array<i32>} : memref<2x1xf32, #tpu.memory_space<vmem>>, vector<2x1xf32>,
    %c0_12 = arith.constant 0 : index
    %c0_13 = arith.constant 0 : index
    %c0_14 = arith.constant 0 : index
    %25 = vector.load %arg1[%c0_12, %c0_13, %c0_14] : memref<4x2x128xf32, #tpu.memory_space<vmem>>, vector<4x2x128xf32>
    %c0_15 = arith.constant 0 : index
    %c0_16 = arith.constant 0 : index
    %c0_17 = arith.constant 0 : index
    %26 = vector.load %arg2[%c0_15, %c0_16, %c0_17] : memref<4x1x128xf32, #tpu.memory_space<vmem>>, vector<4x1x128xf32>
    %27 = vector.extract_strided_slice %25 {offsets = [0, 0, 0], sizes = [1, 2, 128], strides = [1, 1, 1]} : vector<4x2x128xf32> to vector<1x2x128xf32>
    %28 = vector.shape_cast %27 : vector<1x2x128xf32> to vector<2x128xf32>
    %29 = vector.extract_strided_slice %25 {offsets = [1, 0, 0], sizes = [1, 2, 128], strides = [1, 1, 1]} : vector<4x2x128xf32> to vector<1x2x128xf32>
    %30 = vector.shape_cast %29 : vector<1x2x128xf32> to vector<2x128xf32>
    %31 = vector.extract_strided_slice %25 {offsets = [2, 0, 0], sizes = [1, 2, 128], strides = [1, 1, 1]} : vector<4x2x128xf32> to vector<1x2x128xf32>
    %32 = vector.shape_cast %31 : vector<1x2x128xf32> to vector<2x128xf32>
    %33 = vector.extract_strided_slice %25 {offsets = [3, 0, 0], sizes = [1, 2, 128], strides = [1, 1, 1]} : vector<4x2x128xf32> to vector<1x2x128xf32>
    %34 = vector.shape_cast %33 : vector<1x2x128xf32> to vector<2x128xf32>
    %35 = vector.extract_strided_slice %26 {offsets = [0, 0, 0], sizes = [1, 1, 128], strides = [1, 1, 1]} : vector<4x1x128xf32> to vector<1x1x128xf32>
    %36 = vector.shape_cast %35 : vector<1x1x128xf32> to vector<1x128xf32>
    %37 = vector.extract_strided_slice %26 {offsets = [1, 0, 0], sizes = [1, 1, 128], strides = [1, 1, 1]} : vector<4x1x128xf32> to vector<1x1x128xf32>
    %38 = vector.shape_cast %37 : vector<1x1x128xf32> to vector<1x128xf32>
    %39 = vector.extract_strided_slice %26 {offsets = [2, 0, 0], sizes = [1, 1, 128], strides = [1, 1, 1]} : vector<4x1x128xf32> to vector<1x1x128xf32>
    %40 = vector.shape_cast %39 : vector<1x1x128xf32> to vector<1x128xf32>
    %41 = vector.extract_strided_slice %26 {offsets = [3, 0, 0], sizes = [1, 1, 128], strides = [1, 1, 1]} : vector<4x1x128xf32> to vector<1x1x128xf32>
    %42 = vector.shape_cast %41 : vector<1x1x128xf32> to vector<1x128xf32>
    %43 = vector.broadcast %36 : vector<1x128xf32> to vector<2x128xf32>
    %44 = arith.subf %28, %43 : vector<2x128xf32>
    %45 = math.absf %44 : vector<2x128xf32>
    %46 = vector.broadcast %38 : vector<1x128xf32> to vector<2x128xf32>
    %47 = arith.subf %30, %46 : vector<2x128xf32>
    %48 = math.absf %47 : vector<2x128xf32>
    %49 = arith.addf %45, %48 : vector<2x128xf32>
    %50 = vector.broadcast %40 : vector<1x128xf32> to vector<2x128xf32>
    %51 = arith.subf %32, %50 : vector<2x128xf32>
    %52 = math.absf %51 : vector<2x128xf32>
    %53 = arith.addf %49, %52 : vector<2x128xf32>
    %54 = vector.broadcast %42 : vector<1x128xf32> to vector<2x128xf32>
    %55 = arith.subf %34, %54 : vector<2x128xf32>
    %56 = math.absf %55 : vector<2x128xf32>
    %57 = arith.addf %53, %56 : vector<2x128xf32>
    %58 = vector.broadcast %1 : vector<1x128xf32> to vector<2x128xf32>
    %59 = arith.mulf %57, %58 : vector<2x128xf32>
    %cst_18 = arith.constant dense<0.000000e+00> : vector<2xf32>
    %60 = vector.multi_reduction <add>, %59, %cst_18 [1] : vector<2x128xf32> to vector<2xf32>
    %61 = vector.shape_cast %60 : vector<2xf32> to vector<2x1xf32>
    %c0_19 = arith.constant 0 : index
    %c0_20 = arith.constant 0 : index
    %62 = vector.load %arg6[%c0_19, %c0_20] : memref<2x1xf32, #tpu.memory_space<vmem>>, vector<2x1xf32>
    tpu.vector_store %arg6[%c0_19, %c0_20], %61 {strides = array<i32>} : memref<2x1xf32, #tpu.memory_space<vmem>>, vector<2x1xf32>,
    %cst_21 = arith.constant 5.000000e-01 : f32
    %63 = vector.broadcast %cst_21 : f32 to vector<2x128xf32>
    %64 = arith.mulf %63, %32 : vector<2x128xf32>
    %65 = arith.subf %28, %64 : vector<2x128xf32>
    %cst_22 = arith.constant 5.000000e-01 : f32
    %66 = vector.broadcast %cst_22 : f32 to vector<2x128xf32>
    %67 = arith.mulf %66, %34 : vector<2x128xf32>
    %68 = arith.subf %30, %67 : vector<2x128xf32>
    %cst_23 = arith.constant 5.000000e-01 : f32
    %69 = vector.broadcast %cst_23 : f32 to vector<2x128xf32>
    %70 = arith.mulf %69, %32 : vector<2x128xf32>
    %71 = arith.addf %28, %70 : vector<2x128xf32>
    %cst_24 = arith.constant 5.000000e-01 : f32
    %72 = vector.broadcast %cst_24 : f32 to vector<2x128xf32>
    %73 = arith.mulf %72, %34 : vector<2x128xf32>
    %74 = arith.addf %30, %73 : vector<2x128xf32>
    %cst_25 = arith.constant 5.000000e-01 : f32
    %75 = vector.broadcast %cst_25 : f32 to vector<1x128xf32>
    %76 = arith.mulf %75, %40 : vector<1x128xf32>
    %77 = arith.subf %36, %76 : vector<1x128xf32>
    %cst_26 = arith.constant 5.000000e-01 : f32
    %78 = vector.broadcast %cst_26 : f32 to vector<1x128xf32>
    %79 = arith.mulf %78, %42 : vector<1x128xf32>
    %80 = arith.subf %38, %79 : vector<1x128xf32>
    %cst_27 = arith.constant 5.000000e-01 : f32
    %81 = vector.broadcast %cst_27 : f32 to vector<1x128xf32>
    %82 = arith.mulf %81, %40 : vector<1x128xf32>
    %83 = arith.addf %36, %82 : vector<1x128xf32>
    %cst_28 = arith.constant 5.000000e-01 : f32
    %84 = vector.broadcast %cst_28 : f32 to vector<1x128xf32>
    %85 = arith.mulf %84, %42 : vector<1x128xf32>
    %86 = arith.addf %38, %85 : vector<1x128xf32>
    %87 = arith.subf %71, %65 : vector<2x128xf32>
    %88 = arith.subf %74, %68 : vector<2x128xf32>
    %89 = arith.mulf %87, %88 : vector<2x128xf32>
    %90 = arith.subf %83, %77 : vector<1x128xf32>
    %91 = arith.subf %86, %80 : vector<1x128xf32>
    %92 = arith.mulf %90, %91 : vector<1x128xf32>
    %93 = vector.broadcast %83 : vector<1x128xf32> to vector<2x128xf32>
    %94 = arith.minimumf %71, %93 : vector<2x128xf32>
    %95 = vector.broadcast %77 : vector<1x128xf32> to vector<2x128xf32>
    %96 = arith.maximumf %65, %95 : vector<2x128xf32>
    %97 = arith.subf %94, %96 : vector<2x128xf32>
    %cst_29 = arith.constant 0.000000e+00 : f32
    %98 = vector.broadcast %cst_29 : f32 to vector<2x128xf32>
    %99 = arith.maximumf %97, %98 : vector<2x128xf32>
    %100 = vector.broadcast %86 : vector<1x128xf32> to vector<2x128xf32>
    %101 = arith.minimumf %74, %100 : vector<2x128xf32>
    %102 = vector.broadcast %80 : vector<1x128xf32> to vector<2x128xf32>
    %103 = arith.maximumf %68, %102 : vector<2x128xf32>
    %104 = arith.subf %101, %103 : vector<2x128xf32>
    %cst_30 = arith.constant 0.000000e+00 : f32
    %105 = vector.broadcast %cst_30 : f32 to vector<2x128xf32>
    %106 = arith.maximumf %104, %105 : vector<2x128xf32>
    %107 = arith.mulf %99, %106 : vector<2x128xf32>
    %108 = vector.broadcast %92 : vector<1x128xf32> to vector<2x128xf32>
    %109 = arith.addf %89, %108 : vector<2x128xf32>
    %110 = arith.subf %109, %107 : vector<2x128xf32>
    %111 = vector.broadcast %83 : vector<1x128xf32> to vector<2x128xf32>
    %112 = arith.maximumf %71, %111 : vector<2x128xf32>
    %113 = vector.broadcast %77 : vector<1x128xf32> to vector<2x128xf32>
    %114 = arith.minimumf %65, %113 : vector<2x128xf32>
    %115 = arith.subf %112, %114 : vector<2x128xf32>
    %116 = vector.broadcast %86 : vector<1x128xf32> to vector<2x128xf32>
    %117 = arith.maximumf %74, %116 : vector<2x128xf32>
    %118 = vector.broadcast %80 : vector<1x128xf32> to vector<2x128xf32>
    %119 = arith.minimumf %68, %118 : vector<2x128xf32>
    %120 = arith.subf %117, %119 : vector<2x128xf32>
    %121 = arith.mulf %115, %120 : vector<2x128xf32>
    %122 = tpu.reciprocal %110 {approx = true} : vector<2x128xf32> -> vector<2x128xf32>
    %123 = arith.mulf %110, %122 : vector<2x128xf32>
    %cst_31 = arith.constant 2.000000e+00 : f32
    %124 = vector.broadcast %cst_31 : f32 to vector<2x128xf32>
    %125 = arith.subf %124, %123 : vector<2x128xf32>
    %126 = arith.mulf %122, %125 : vector<2x128xf32>
    %127 = arith.mulf %110, %126 : vector<2x128xf32>
    %cst_32 = arith.constant 2.000000e+00 : f32
    %128 = vector.broadcast %cst_32 : f32 to vector<2x128xf32>
    %129 = arith.subf %128, %127 : vector<2x128xf32>
    %130 = arith.mulf %126, %129 : vector<2x128xf32>
    %131 = tpu.reciprocal %121 {approx = true} : vector<2x128xf32> -> vector<2x128xf32>
    %132 = arith.mulf %121, %131 : vector<2x128xf32>
    %cst_33 = arith.constant 2.000000e+00 : f32
    %133 = vector.broadcast %cst_33 : f32 to vector<2x128xf32>
    %134 = arith.subf %133, %132 : vector<2x128xf32>
    %135 = arith.mulf %131, %134 : vector<2x128xf32>
    %136 = arith.mulf %121, %135 : vector<2x128xf32>
    %cst_34 = arith.constant 2.000000e+00 : f32
    %137 = vector.broadcast %cst_34 : f32 to vector<2x128xf32>
    %138 = arith.subf %137, %136 : vector<2x128xf32>
    %139 = arith.mulf %135, %138 : vector<2x128xf32>
    %140 = arith.mulf %107, %130 : vector<2x128xf32>
    %141 = arith.subf %121, %110 : vector<2x128xf32>
    %142 = arith.mulf %141, %139 : vector<2x128xf32>
    %143 = arith.subf %140, %142 : vector<2x128xf32>
    %cst_35 = arith.constant 5.000000e-01 : f32
    %144 = vector.broadcast %cst_35 : f32 to vector<1x128xf32>
    %145 = arith.cmpf ogt, %1, %144 : vector<1x128xf32>
    %cst_36 = arith.constant 1.000000e+00 : f32
    %146 = vector.broadcast %cst_36 : f32 to vector<2x128xf32>
    %147 = arith.subf %146, %143 : vector<2x128xf32>
    %cst_37 = arith.constant 0.000000e+00 : f32
    %148 = vector.shape_cast %145 : vector<1x128xi1> to vector<1x128xi1>
    %149 = vector.broadcast %148 : vector<1x128xi1> to vector<2x128xi1>
    %150 = vector.broadcast %cst_37 : f32 to vector<2x128xf32>
    %151 = arith.select %149, %147, %150 : vector<2x128xi1>, vector<2x128xf32>
    %cst_38 = arith.constant dense<0.000000e+00> : vector<2xf32>
    %152 = vector.multi_reduction <add>, %151, %cst_38 [1] : vector<2x128xf32> to vector<2xf32>
    %153 = vector.shape_cast %152 : vector<2xf32> to vector<2x1xf32>
    %c0_39 = arith.constant 0 : index
    %c0_40 = arith.constant 0 : index
    %154 = vector.load %arg7[%c0_39, %c0_40] : memref<2x1xf32, #tpu.memory_space<vmem>>, vector<2x1xf32>
    tpu.vector_store %arg7[%c0_39, %c0_40], %153 {strides = array<i32>} : memref<2x1xf32, #tpu.memory_space<vmem>>, vector<2x1xf32>,
    %cst_41 = arith.constant dense<0.000000e+00> : vector<1xf32>
    %155 = vector.multi_reduction <add>, %0, %cst_41 [1] : vector<1x128xf32> to vector<1xf32>
    %156 = vector.shape_cast %155 : vector<1xf32> to vector<1x1xf32>
    %c0_42 = arith.constant 0 : index
    %c0_43 = arith.constant 0 : index
    %157 = vector.load %arg8[%c0_42, %c0_43] : memref<2x1xf32, #tpu.memory_space<vmem>>, vector<1x1xf32>
    tpu.vector_store %arg8[%c0_42, %c0_43], %156 {strides = array<i32>} : memref<2x1xf32, #tpu.memory_space<vmem>>, vector<1x1xf32>,
    %cst_44 = arith.constant dense<0.000000e+00> : vector<1xf32>
    %158 = vector.multi_reduction <add>, %1, %cst_44 [1] : vector<1x128xf32> to vector<1xf32>
    %159 = vector.shape_cast %158 : vector<1xf32> to vector<1x1xf32>
    %c1 = arith.constant 1 : index
    %c0_45 = arith.constant 0 : index
    %160 = vector.load %arg8[%c1, %c0_45] : memref<2x1xf32, #tpu.memory_space<vmem>>, vector<1x1xf32>
    tpu.vector_store %arg8[%c1, %c0_45], %159 {strides = array<i32>} : memref<2x1xf32, #tpu.memory_space<vmem>>, vector<1x1xf32>,
    return
  }
}

</mosaic_0001>

<bundles_post_ra>
// kernel: _criterion_forward.1
= control target key start
LH: loop header
LB: loop body
LE: loop exit
PB: predicated region body
PF: predicated region fallthrough
CT: control target
= control target key end

     0   :  { %v35_v0 = vlaneseq  ;;  %vm58_vm0 = vcmask 1041408   ;;  %vm209_vm2 = vcmask 1040384   ;;  %vm62_vm4 = vcmask 1024   ;;  %s364_s1 = inlined_call_operand.vmem [shape: f32[4,2,128], index: 1, kind: input, shape index: {}]   ;;  %s365_s2 = inlined_call_operand.vmem [shape: f32[4,1,128], index: 2, kind: input, shape index: {}]   ;;  %s366_s0 = inlined_call_operand.vmem [shape: f32[2,128], index: 0, kind: input, shape index: {}]   ;;  %s367_s4 = inlined_call_operand.vmem [shape: f32[1,128], index: 4, kind: input, shape index: {}]   ;;  %s368_s3 = inlined_call_operand.vmem [shape: f32[1,128], index: 3, kind: input, shape index: {}]   ;;  %s369_s6 = inlined_call_operand.vmem [shape: f32[2,1], index: 6, kind: output, shape index: {1}]   ;;  %s370_s5 = inlined_call_operand.vmem [shape: f32[2,1], index: 5, kind: output, shape index: {0}]   ;;  %s371_s8 = inlined_call_operand.vmem [shape: f32[2,1], index: 8, kind: output, shape index: {3}]   ;;  %s372_s7 = inlined_call_operand.vmem [shape: f32[2,1], index: 7, kind: output, shape index: {2}]  }
   0x1   :  { %v66_v2 = vld [vmem:[%s364_s1 + $0x4] sm:$0x3]  ;;  %v67_v3 = vld [vmem:[%s364_s1 + $0x6] sm:$0x3]  ;;  %v64_v4 = vld [vmem:[%s364_s1] sm:$0x3] }
   0x2   :  { %v36_v1 = vshrl.u32 %v35_v0, 7  ;;  %v65_v5 = vld [vmem:[%s364_s1 + $0x2] sm:$0x3]  ;;  %v112_v9 = vmul.f32 0.5, %v66_v2  ;;  %v114_v10 = vmul.f32 0.5, %v67_v3  ;;  %vm213_vm5 = vcmask 0  }
   0x3   :  { %v70_v6 = vld [vmem:[%s365_s2 + $0x2] sm:$0x1]  ;;  %v71_v8 = vld [vmem:[%s365_s2 + $0x3] sm:$0x1]  ;;  %v68_v11 = vld [vmem:[%s365_s2] sm:$0x1] }
   0x4   :  { %v305_v7 = vsub.s32 0, %v36_v1  ;;  %v69_v12 = vld [vmem:[%s365_s2 + $0x1] sm:$0x1]  ;;  %v118_v13 = vmul.f32 0.5, %v70_v6  ;;  %v120_v14 = vmul.f32 0.5, %v71_v8  ;;  %v113_v19 = vsub.f32 %v64_v4, %v112_v9 }
   0x5   :  { %v115_v20 = vsub.f32 %v65_v5, %v114_v10  ;;  %v116_v21 = vadd.f32 %v112_v9, %v64_v4  ;;  %v117_v25 = vadd.f32 %v114_v10, %v65_v5  ;;  %v26_v30 = vld [vmem:[%s366_s0] sm:$0x3] }
   0x6   :  { %v76_v15 = vrot.slane %v68_v11, %v305_v7  ;;  %v84_v16 = vrot.slane %v69_v12, %v305_v7  ;;  %v93_v17 = vrot.slane %v70_v6, %v305_v7  ;;  %v102_v18 = vrot.slane %v71_v8, %v305_v7  ;;  %v326_v38 = vld [vmem:[%s367_s4] sm:$0x1] }
   0x7   :  { %v119_v27 = vsub.f32 %v68_v11, %v118_v13  ;;  %v121_v28 = vsub.f32 %v69_v12, %v120_v14  ;;  %v122_v29 = vadd.f32 %v118_v13, %v68_v11  ;;  %v123_v34 = vadd.f32 %v120_v14, %v69_v12 }
   0x8   :  { %v78_v22 = vsub.f32 %v64_v4, %v76_v15  ;;  %v86_v23 = vsub.f32 %v65_v5, %v84_v16  ;;  %v95_v24 = vsub.f32 %v66_v2, %v93_v17  ;;  %v104_v26 = vsub.f32 %v67_v3, %v102_v18 }
   0x9   :  { %v125_v36 = vsub.f32 %v117_v25, %v115_v20  ;;  %v127_v37 = vsub.f32 %v122_v29, %v119_v27  ;;  %236 = vlog2.f32 %v26_v30  ;;  %v128_v40 = vsub.f32 %v123_v34, %v121_v28 }
   0xa   :  { %v79_v31 = vand.u32 2147483647, %v78_v22  ;;  %v87_v32 = vand.u32 2147483647, %v86_v23  ;;  %v96_v33 = vand.u32 2147483647, %v95_v24  ;;  %v124_v41 = vsub.f32 %v116_v21, %v113_v19 }
   0xb   :  { %v105_v35 = vand.u32 2147483647, %v104_v26  ;;  %v134_v42 = vrot.slane %v122_v29, %v305_v7  ;;  %v38_v43 = vrot.slane %v326_v38, %v305_v7  ;;  %v141_v44 = vrot.slane %v119_v27, %v305_v7 }
   0xc   :  { %v88_v39 = vadd.f32 %v87_v32, %v79_v31  ;;  %v150_v45 = vrot.slane %v123_v34, %v305_v7  ;;  %v157_v46 = vrot.slane %v121_v28, %v305_v7  ;;  %v126_v48 = vmul.f32 %v125_v36, %v124_v41 }
   0xd   :  { %v129_v49 = vmul.f32 %v128_v40, %v127_v37  ;;  %v136_v50 = vmin.f32 %v116_v21, %v134_v42  ;;  %v143_v51 = vmax.f32 %v113_v19, %v141_v44  ;;  %v171_v54 = vmax.f32 %v116_v21, %v134_v42  ;;  %v24_v21 = vld [vmem:[%s368_s3] sm:$0x1] }
   0xe   :  { %v97_v47 = vadd.f32 %v96_v33, %v88_v39  ;;  %v152_v52 = vmin.f32 %v117_v25, %v150_v45  ;;  %v159_v53 = vmax.f32 %v115_v20, %v157_v46  ;;  %v172_v57 = vmin.f32 %v113_v19, %v141_v44 }
   0xf   :  { %v167_v56 = vrot.slane %v129_v49, %v305_v7  ;;  %v174_v58 = vmax.f32 %v117_v25, %v150_v45  ;;  %v144_v59 = vsub.f32 %v136_v50, %v143_v51  ;;  %v175_v61 = vmin.f32 %v115_v20, %v157_v46 }
  0x10   :  { %v106_v55 = vadd.f32 %v105_v35, %v97_v47  ;;  %v160_v60 = vsub.f32 %v152_v52, %v159_v53  ;;  %v173_v63 = vsub.f32 %v171_v54, %v172_v57  ;;  %v30_v0 = vsub.f32 1.0, %v26_v30 }
  0x11   :  { %v145_v1 = vmax.f32 %v144_v59, 0.0  ;;  %v169_v3 = vadd.f32 %v167_v56, %v126_v48  ;;  %v176_v4 = vsub.f32 %v174_v58, %v175_v61  ;;  %v41_v12 = vsub.f32 1.0, %v326_v38 }
  0x12   :  { %v107_v62 = vmul.f32 %v106_v55, %v38_v43  ;;  %v161_v2 = vmax.f32 %v160_v60, 0.0  ;;  %238 = vlog2.f32 %v30_v0  ;;  %v55_v27 = vrot.slane %v24_v21, %v305_v7 }
  0x13   :  { %v237_v6 = vpop.eup %236  ;;  %v177_v9 = vmul.f32 %v176_v4, %v173_v63  ;;  %v46_v16 = vrot.slane %v41_v12, %v305_v7  ;;  %vm196_vm1 = vcmp.gt.f32.partialorder %v326_v38, 0.5  ;;  %v244_v41 = vmov 0  }
  0x14   :  { %v108_v5 = vsel %vm58_vm0, %v107_v62, 0.0  ;;  %v162_v8 = vmul.f32 %v161_v2, %v145_v1  ;;  %v28_v11 = vmul.f32 0.6931472, %v237_v6  ;;  %v198_v42 = vsel %vm196_vm1, 1, %v244_v41 }
  0x15   :  { %109 = vadd.xlane.f32.xlu0 %v108_v5  ;;  %240 = vrcp.f32 %v177_v9  ;;  %v202_v46 = vrot.slane %v198_v42, %v305_v7  ;;  %v210_v52 = vsel %vm209_vm2, %v24_v21, 0.0 }
  0x16   :  { %v170_v10 = vsub.f32 %v169_v3, %v162_v8  ;;  %v29_v13 = vmax.f32 %v28_v11, -100.0 }
  0x17   :  { %vm203_vm3 = vcmp.eq.s32.totalorder %v202_v46, 1 }
  0x18   :  { %242 = vrcp.f32 %v170_v10  ;;  %v40_v18 = vmul.f32 %v38_v43, %v29_v13  ;;  %v193_v36 = vsub.f32 %v177_v9, %v170_v10  ;;  %v215_v43 = vsel %vm209_vm2, %v326_v38, 0.0 }
  0x1c   :  { %v239_v14 = vpop.eup %238 }
  0x1d   :  { %v32_v15 = vmul.f32 0.6931472, %v239_v14 }
  0x1f   :  { %v241_v17 = vpop.eup %240  ;;  %v33_v19 = vmax.f32 %v32_v15, -100.0 }
  0x20   :  { %v186_v20 = vmul.f32 %v241_v17, %v177_v9 }
  0x21   :  { %v48_v23 = vmul.f32 %v46_v16, %v33_v19 }
  0x22   :  { %v243_v22 = vpop.eup %242  ;;  %v187_v25 = vsub.f32 2.0, %v186_v20 }
  0x23   :  { %v179_v24 = vmul.f32 %v243_v22, %v170_v10  ;;  %v49_v26 = vadd.f32 %v48_v23, %v40_v18 }
  0x24   :  { %v188_v29 = vmul.f32 %v241_v17, %v187_v25 }
  0x25   :  { %v180_v28 = vsub.f32 2.0, %v179_v24  ;;  %v50_v30 = vsub.f32 0.0, %v49_v26 }
  0x26   :  { %v189_v32 = vmul.f32 %v188_v29, %v177_v9 }
  0x27   :  { %v181_v31 = vmul.f32 %v243_v22, %v180_v28  ;;  %v57_v33 = vmul.f32 %v55_v27, %v50_v30 }
  0x28   :  { %v190_v35 = vsub.f32 2.0, %v189_v32 }
  0x29   :  { %v182_v34 = vmul.f32 %v181_v31, %v170_v10  ;;  %v59_v37 = vsel %vm58_vm0, %v57_v33, 0.0 }
  0x2a   :  { %v191_v40 = vmul.f32 %v190_v35, %v188_v29  ;;  %60 = vadd.xlane.f32.xlu0 %v59_v37 }
  0x2b   :  { %v183_v39 = vsub.f32 2.0, %v182_v34 }
  0x2c   :  { %v194_v45 = vmul.f32 %v193_v36, %v191_v40 }
  0x2d   :  { %v184_v44 = vmul.f32 %v183_v39, %v181_v31 }
  0x2e   :  { %216 = vadd.xlane.f32.xlu0 %v215_v43 }
  0x2f   :  { %v192_v47 = vmul.f32 %v184_v44, %v162_v8 }
  0x31   :  { %v195_v48 = vsub.f32 %v192_v47, %v194_v45 }
  0x33   :  { %v197_v49 = vsub.f32 1.0, %v195_v48 }
  0x35   :  { %v204_v50 = vsel %vm203_vm3, %v197_v49, 0.0 }
  0x36   :  { %v205_v51 = vsel %vm58_vm0, %v204_v50, 0.0 }
  0x37   :  { %206 = vadd.xlane.f32.xlu1 %v205_v51 }
  0x3b   :  { %211 = vadd.xlane.f32.xlu1 %v210_v52 }
  0xa2   :  { %v110_v53 = vpop.xlane.xlu0 %109 }
  0xa3   :  { %111 = vst.msk [vmem:[%s369_s6] sm:$0x3] %vm62_vm4, %v110_v53 }
  0xb7   :  { %v61_v38 = vpop.xlane.xlu0 %60 }
  0xb8   :  { %63 = vst.msk [vmem:[%s370_s5] sm:$0x3] %vm62_vm4, %v61_v38 }
  0xbb   :  { %v217_v7 = vpop.xlane.xlu0 %216 }
  0xbc   :  { %218 = vst.msk [vmem:[%s371_s8 + $0x1] sm:$0x1] %vm213_vm5, %v217_v7 }
  0xc4   :  { %v207_v54 = vpop.xlane.xlu1 %206 }
  0xc5   :  { %208 = vst.msk [vmem:[%s372_s7] sm:$0x3] %vm62_vm4, %v207_v54 }
  0xc8   :  { %v212_v55 = vpop.xlane.xlu1 %211 }
  0xc9   :  { %214 = vst.msk [vmem:[%s371_s8] sm:$0x1] %vm213_vm5, %v212_v55 }

</bundles_post_ra>
